<compile_context>
chip_gen: v7x
topology: tpu7x:2x2x1
jax: 0.10.0
libtpu: 0.0.40
codegen_flags: <defaults>
</compile_context>

<pallas_src>
import functools

import jax
import jax.numpy as jnp
import numpy as np
from jax.experimental import pallas as pl
from jax.experimental.pallas import tpu as pltpu
from jax.scipy.linalg import block_diag


# ----------------------------- Pallas kernel --------------------------------

def _rnd_fused_kernel(x_ref, w1_ref, b1_ref, w2_ref, b2_ref, w3_ref, b3_ref,
                      out_ref):
    """One fused 3-layer MLP computing both heads for a (block_b, obs_dim) tile.

    x / weights are bf16 (MXU-native); accumulation, bias add and ReLU are f32.
    Output is [block_b, 2*feature_dim]: [:, :F] = target, [:, F:] = predictor.
    """
    h1 = jnp.dot(x_ref[...], w1_ref[...], preferred_element_type=jnp.float32)
    h1 = jnp.maximum(h1 + b1_ref[...], 0.0)

    h2 = jnp.dot(h1.astype(w2_ref.dtype), w2_ref[...],
                 preferred_element_type=jnp.float32)
    h2 = jnp.maximum(h2 + b2_ref[...], 0.0)

    out = jnp.dot(h2.astype(w3_ref.dtype), w3_ref[...],
                  preferred_element_type=jnp.float32)
    out_ref[...] = (out + b3_ref[...]).astype(out_ref.dtype)


# ------------------------------- wrapper -------------------------------------

def _round_up(x, m):
    return (x + m - 1) // m * m


@functools.partial(jax.jit, static_argnames=("block_b", "compute_dtype"))
def rnd_output_heads(x, target_params, predictor_params, *,
                     block_b=128, compute_dtype=jnp.bfloat16):
    """Returns (target_output, predictor_output), matching the PyTorch forward.

    block_b: batch tile (rows per grid step). 128 saturates the v5e MXU; use 256
    on v6e/v7x when the batch is large enough to keep the grid >= 2 steps.
    """
    B, obs_dim = x.shape
    tw1, tb1, tw2, tb2, tw3, tb3 = target_params
    pw1, pb1, pw2, pb2, pw3, pb3 = predictor_params
    hidden_dim = tw1.shape[1]
    feature_dim = tw3.shape[1]
    H2, F2 = 2 * hidden_dim, 2 * feature_dim

    # ---- fuse the two heads into one MLP (block-diagonal hidden layers) ----
    w1f = jnp.concatenate([tw1, pw1], axis=1).astype(compute_dtype)   # [obs, 2H]
    w2f = block_diag(tw2, pw2).astype(compute_dtype)                  # [2H, 2H]
    w3f = block_diag(tw3, pw3).astype(compute_dtype)                  # [2H, 2F]
    b1f = jnp.concatenate([tb1, pb1], axis=1).astype(jnp.float32)     # [1, 2H]
    b2f = jnp.concatenate([tb2, pb2], axis=1).astype(jnp.float32)     # [1, 2H]
    b3f = jnp.concatenate([tb3, pb3], axis=1).astype(jnp.float32)     # [1, 2F]

    # ---- batch tiling: pad B up instead of asserting divisibility ----
    bb = min(block_b, _round_up(B, 8))
    pad_b = _round_up(B, bb)
    x_c = x.astype(compute_dtype)
    if pad_b != B:
        x_c = jnp.pad(x_c, ((0, pad_b - B), (0, 0)))
    grid = (pad_b // bb,)

    # ---- block specs ----
    def full_spec(arr):
        # Constant-index full-array block: DMA'd once, resident across the grid.
        return pl.BlockSpec(arr.shape, lambda i: (0, 0))

    x_spec = pl.BlockSpec((bb, obs_dim), lambda i: (i, 0))
    out_spec = pl.BlockSpec((bb, F2), lambda i: (i, 0))

    grid_spec = pltpu.PrefetchScalarGridSpec(
        num_scalar_prefetch=0,
        grid=grid,
        in_specs=[x_spec,
                  full_spec(w1f), full_spec(b1f),
                  full_spec(w2f), full_spec(b2f),
                  full_spec(w3f), full_spec(b3f)],
        out_specs=out_spec,
    )

    # ---- advisory cost estimate for XLA's scheduler ----
    param_bytes = sum(int(a.size) * a.dtype.itemsize
                      for a in (w1f, b1f, w2f, b2f, w3f, b3f))
    flops = 2 * pad_b * (obs_dim * H2 + H2 * H2 + H2 * F2)
    bytes_accessed = (pad_b * obs_dim * jnp.dtype(compute_dtype).itemsize
                      + param_bytes
                      + pad_b * F2 * 4)
    cost = pl.CostEstimate(flops=int(flops), transcendentals=0,
                           bytes_accessed=int(bytes_accessed))

    # ---- explicit VMEM budget: double-buffered x/out tiles + resident params ----
    tile_bytes = 2 * (bb * obs_dim * jnp.dtype(compute_dtype).itemsize
                      + bb * F2 * 4)
    vmem_limit = min(int(1.5 * (tile_bytes + 2 * param_bytes)) + (4 << 20),
                     32 << 20)

    out = pl.pallas_call(
        _rnd_fused_kernel,
        out_shape=jax.ShapeDtypeStruct((pad_b, F2), jnp.float32),
        grid_spec=grid_spec,
        compiler_params=pltpu.CompilerParams(
            dimension_semantics=("parallel",),
            vmem_limit_bytes=vmem_limit,
        ),
        cost_estimate=cost,
    )(x_c, w1f, b1f, w2f, b2f, w3f, b3f)

    out = out[:B]
    return out[:, :feature_dim], out[:, feature_dim:]


# ------------------------ deterministic parameter init ----------------------

def _orthogonal(key, out_dim, in_dim, gain):
    """Orthogonal init (gain-scaled), matching torch.nn.init.orthogonal_ semantics."""
    rows, cols = out_dim, in_dim
    flat = jax.random.normal(key, (max(rows, cols), min(rows, cols)), jnp.float32)
    q, r = jnp.linalg.qr(flat)
    q = q * jnp.sign(jnp.diag(r))  # make decomposition unique
    if rows < cols:
        q = q.T
    return gain * q[:rows, :cols]  # [out, in]


def make_mlp_params(key, obs_dim, hidden_dim, feature_dim):
    gain = float(np.sqrt(2.0))
    k1, k2, k3 = jax.random.split(key, 3)
    # PyTorch weight is [out, in]; store transposed as [in, out] for x @ W.
    w1 = _orthogonal(k1, hidden_dim, obs_dim, gain).T
    w2 = _orthogonal(k2, hidden_dim, hidden_dim, gain).T
    w3 = _orthogonal(k3, feature_dim, hidden_dim, gain).T
    b1 = jnp.zeros((1, hidden_dim), jnp.float32)
    b2 = jnp.zeros((1, hidden_dim), jnp.float32)
    b3 = jnp.zeros((1, feature_dim), jnp.float32)
    return (w1, b1, w2, b2, w3, b3)


def mlp_reference(x, params, compute_dtype=jnp.bfloat16):
    """Pure-JAX reference using the same bf16 matmul operands / f32 accumulation."""
    w1, b1, w2, b2, w3, b3 = params
    cd = compute_dtype
    h1 = jnp.maximum(
        jnp.dot(x.astype(cd), w1.astype(cd),
                preferred_element_type=jnp.float32) + b1, 0.0)
    h2 = jnp.maximum(
        jnp.dot(h1.astype(cd), w2.astype(cd),
                preferred_element_type=jnp.float32) + b2, 0.0)
    return jnp.dot(h2.astype(cd), w3.astype(cd),
                   preferred_element_type=jnp.float32) + b3


# ----------------------------------- main ------------------------------------

if __name__ == "__main__":
    # Small shapes consistent with the module; batch sized so the grid has 2
    # steps at block_b=128 (feeds both TensorCores on v7x).
    B, OBS_DIM, HIDDEN_DIM, FEATURE_DIM = 256, 32, 32, 64

    key = jax.random.PRNGKey(0)
    kx, kt, kp = jax.random.split(key, 3)

    x = jax.random.normal(kx, (B, OBS_DIM), jnp.float32)
    target_params = make_mlp_params(kt, OBS_DIM, HIDDEN_DIM, FEATURE_DIM)
    predictor_params = make_mlp_params(kp, OBS_DIM, HIDDEN_DIM, FEATURE_DIM)

    tgt_out, pred_out = rnd_output_heads(x, target_params, predictor_params,
                                         block_b=128)
    jax.block_until_ready((tgt_out, pred_out))

    # Sanity check against a pure-JAX reference with the same bf16 operands.
    tgt_ref = mlp_reference(x, target_params)
    pred_ref = mlp_reference(x, predictor_params)
    np.testing.assert_allclose(np.asarray(tgt_out), np.asarray(tgt_ref),
                               rtol=2e-3, atol=2e-3)
    np.testing.assert_allclose(np.asarray(pred_out), np.asarray(pred_ref),
                               rtol=2e-3, atol=2e-3)

    print("KERNEL_OK")
</pallas_src>

<mosaic_0001>
module attributes {stable_mosaic.version = 11 : i64} {
  func.func @_rnd_fused_kernel(%arg0: i32, %arg1: memref<128x32xbf16, #tpu.memory_space<vmem>>, %arg2: memref<32x64xbf16, #tpu.memory_space<vmem>>, %arg3: memref<1x64xf32, #tpu.memory_space<vmem>>, %arg4: memref<64x64xbf16, #tpu.memory_space<vmem>>, %arg5: memref<1x64xf32, #tpu.memory_space<vmem>>, %arg6: memref<64x128xbf16, #tpu.memory_space<vmem>>, %arg7: memref<1x128xf32, #tpu.memory_space<vmem>>, %arg8: memref<128x128xf32, #tpu.memory_space<vmem>>) attributes {dimension_semantics = [#tpu.dimension_semantics<parallel>], iteration_bounds = array<i64: 2>, scalar_prefetch = 0 : i64, scratch_operands = 0 : i64, tpu.core_type = #tpu.core_type<tc>, window_params = [{transform_indices = @transform_0, window_bounds = array<i64: 128, 32>}, {pipeline_mode = #tpu.pipeline_mode<synchronous>, transform_indices = @transform_1, window_bounds = array<i64: 32, 64>}, {pipeline_mode = #tpu.pipeline_mode<synchronous>, transform_indices = @transform_2, window_bounds = array<i64: 1, 64>}, {pipeline_mode = #tpu.pipeline_mode<synchronous>, transform_indices = @transform_3, window_bounds = array<i64: 64, 64>}, {pipeline_mode = #tpu.pipeline_mode<synchronous>, transform_indices = @transform_4, window_bounds = array<i64: 1, 64>}, {pipeline_mode = #tpu.pipeline_mode<synchronous>, transform_indices = @transform_5, window_bounds = array<i64: 64, 128>}, {pipeline_mode = #tpu.pipeline_mode<synchronous>, transform_indices = @transform_6, window_bounds = array<i64: 1, 128>}, {transform_indices = @transform_7, window_bounds = array<i64: 128, 128>}]} {
    %c0 = arith.constant 0 : index
    %c0_0 = arith.constant 0 : index
    %0 = vector.load %arg1[%c0, %c0_0] : memref<128x32xbf16, #tpu.memory_space<vmem>>, vector<128x32xbf16>
    %c0_1 = arith.constant 0 : index
    %c0_2 = arith.constant 0 : index
    %1 = vector.load %arg2[%c0_1, %c0_2] : memref<32x64xbf16, #tpu.memory_space<vmem>>, vector<32x64xbf16>
    %cst = arith.constant dense<0.000000e+00> : vector<128x64xf32>
    %2 = tpu.matmul %0, %1, %cst {dimension_numbers = #tpu.dot_dimension_numbers<[1], [0], [0], [1], [0, 0, 1, 1], [], []>} : vector<128x32xbf16>, vector<32x64xbf16>, vector<128x64xf32> -> vector<128x64xf32>
    %c0_3 = arith.constant 0 : index
    %c0_4 = arith.constant 0 : index
    %3 = vector.load %arg3[%c0_3, %c0_4] : memref<1x64xf32, #tpu.memory_space<vmem>>, vector<1x64xf32>
    %4 = vector.broadcast %3 : vector<1x64xf32> to vector<128x64xf32>
    %5 = arith.addf %2, %4 : vector<128x64xf32>
    %cst_5 = arith.constant 0.000000e+00 : f32
    %6 = vector.broadcast %cst_5 : f32 to vector<128x64xf32>
    %7 = arith.maximumf %5, %6 : vector<128x64xf32>
    %8 = arith.truncf %7 : vector<128x64xf32> to vector<128x64xbf16>
    %c0_6 = arith.constant 0 : index
    %c0_7 = arith.constant 0 : index
    %9 = vector.load %arg4[%c0_6, %c0_7] : memref<64x64xbf16, #tpu.memory_space<vmem>>, vector<64x64xbf16>
    %cst_8 = arith.constant dense<0.000000e+00> : vector<128x64xf32>
    %10 = tpu.matmul %8, %9, %cst_8 {dimension_numbers = #tpu.dot_dimension_numbers<[1], [0], [0], [1], [0, 0, 1, 1], [], []>} : vector<128x64xbf16>, vector<64x64xbf16>, vector<128x64xf32> -> vector<128x64xf32>
    %c0_9 = arith.constant 0 : index
    %c0_10 = arith.constant 0 : index
    %11 = vector.load %arg5[%c0_9, %c0_10] : memref<1x64xf32, #tpu.memory_space<vmem>>, vector<1x64xf32>
    %12 = vector.broadcast %11 : vector<1x64xf32> to vector<128x64xf32>
    %13 = arith.addf %10, %12 : vector<128x64xf32>
    %cst_11 = arith.constant 0.000000e+00 : f32
    %14 = vector.broadcast %cst_11 : f32 to vector<128x64xf32>
    %15 = arith.maximumf %13, %14 : vector<128x64xf32>
    %16 = arith.truncf %15 : vector<128x64xf32> to vector<128x64xbf16>
    %c0_12 = arith.constant 0 : index
    %c0_13 = arith.constant 0 : index
    %17 = vector.load %arg6[%c0_12, %c0_13] : memref<64x128xbf16, #tpu.memory_space<vmem>>, vector<64x128xbf16>
    %cst_14 = arith.constant dense<0.000000e+00> : vector<128x128xf32>
    %18 = tpu.matmul %16, %17, %cst_14 {dimension_numbers = #tpu.dot_dimension_numbers<[1], [0], [0], [1], [0, 0, 1, 1], [], []>} : vector<128x64xbf16>, vector<64x128xbf16>, vector<128x128xf32> -> vector<128x128xf32>
    %c0_15 = arith.constant 0 : index
    %c0_16 = arith.constant 0 : index
    %19 = vector.load %arg7[%c0_15, %c0_16] : memref<1x128xf32, #tpu.memory_space<vmem>>, vector<1x128xf32>
    %20 = vector.broadcast %19 : vector<1x128xf32> to vector<128x128xf32>
    %21 = arith.addf %18, %20 : vector<128x128xf32>
    %c0_17 = arith.constant 0 : index
    %c0_18 = arith.constant 0 : index
    %22 = vector.load %arg8[%c0_17, %c0_18] : memref<128x128xf32, #tpu.memory_space<vmem>>, vector<128x128xf32>
    tpu.vector_store %arg8[%c0_17, %c0_18], %21 {strides = array<i32>} : memref<128x128xf32, #tpu.memory_space<vmem>>, vector<128x128xf32>,
    return
  }
  func.func @transform_0(%arg0: i32) -> (i32, i32) {
    %c0_i32 = arith.constant 0 : i32
    %c0_i32_0 = arith.constant 0 : i32
    return %arg0, %c0_i32 : i32, i32
  }
  func.func @transform_1(%arg0: i32) -> (i32, i32) {
    %c0_i32 = arith.constant 0 : i32
    %c0_i32_0 = arith.constant 0 : i32
    %c0_i32_1 = arith.constant 0 : i32
    return %c0_i32, %c0_i32_0 : i32, i32
  }
  func.func @transform_2(%arg0: i32) -> (i32, i32) {
    %c0_i32 = arith.constant 0 : i32
    %c0_i32_0 = arith.constant 0 : i32
    %c0_i32_1 = arith.constant 0 : i32
    return %c0_i32, %c0_i32_0 : i32, i32
  }
  func.func @transform_3(%arg0: i32) -> (i32, i32) {
    %c0_i32 = arith.constant 0 : i32
    %c0_i32_0 = arith.constant 0 : i32
    %c0_i32_1 = arith.constant 0 : i32
    return %c0_i32, %c0_i32_0 : i32, i32
  }
  func.func @transform_4(%arg0: i32) -> (i32, i32) {
    %c0_i32 = arith.constant 0 : i32
    %c0_i32_0 = arith.constant 0 : i32
    %c0_i32_1 = arith.constant 0 : i32
    return %c0_i32, %c0_i32_0 : i32, i32
  }
  func.func @transform_5(%arg0: i32) -> (i32, i32) {
    %c0_i32 = arith.constant 0 : i32
    %c0_i32_0 = arith.constant 0 : i32
    %c0_i32_1 = arith.constant 0 : i32
    return %c0_i32, %c0_i32_0 : i32, i32
  }
  func.func @transform_6(%arg0: i32) -> (i32, i32) {
    %c0_i32 = arith.constant 0 : i32
    %c0_i32_0 = arith.constant 0 : i32
    %c0_i32_1 = arith.constant 0 : i32
    return %c0_i32, %c0_i32_0 : i32, i32
  }
  func.func @transform_7(%arg0: i32) -> (i32, i32) {
    %c0_i32 = arith.constant 0 : i32
    %c0_i32_0 = arith.constant 0 : i32
    return %arg0, %c0_i32 : i32, i32
  }
}

</mosaic_0001>

<bundles_post_ra>
// kernel: rnd_output_heads.1
= control target key start
LH: loop header
LB: loop body
LE: loop exit
PB: predicated region body
PF: predicated region fallthrough
CT: control target
= control target key end

     0   :  { %s1161_s24 = smov 0   ;;  %s1263_s0 = inlined_call_operand.vmem [shape: bf16[256,32], index: 0, kind: input, shape index: {}]   ;;  %s1264_s1 = inlined_call_operand.vmem [shape: bf16[32,64], index: 1, kind: input, shape index: {}]   ;;  %s1265_s2 = inlined_call_operand.vmem [shape: f32[1,64], index: 2, kind: input, shape index: {}]   ;;  %s1266_s3 = inlined_call_operand.vmem [shape: bf16[64,64], index: 3, kind: input, shape index: {}]   ;;  %s1267_s4 = inlined_call_operand.vmem [shape: f32[1,64], index: 4, kind: input, shape index: {}]   ;;  %s1268_s5 = inlined_call_operand.vmem [shape: bf16[64,128], index: 5, kind: input, shape index: {}]   ;;  %s1269_s6 = inlined_call_operand.vmem [shape: f32[1,128], index: 6, kind: input, shape index: {}]   ;;  %s1270_s7 = inlined_call_operand.vmem [shape: f32[256,128], index: 7, kind: output, shape index: {}]  }
   0x1 LB: > { %s925_s25 = sadd.s32 4294967295, %s1119_s24   ;;  %p929_p0 = scmp.ge.s32.totalorder %s1119_s24, 1  ;;  %s1119_s24 = sphi %s1161_s24, %s17_s24  }
   0x2   : > { %p238_p1 = scmp.lt.s32.totalorder %s1119_s24, 3 }
   0x4   : > { %p239_p2 = pnand %p929_p0, %p238_p1 }
   0x5   : > { %v1095_v0 = vld [vmem:[%s1264_s1] sm:$0xff] (!%p239_p2)   ;;  %s930_s28 = sshll.u32 (!%p239_p2), %s925_s25, 4  ;;  %v1096_v1 = vld [vmem:[%s1264_s1 + $0x8] sm:$0xff] (!%p239_p2)   ;;  %vm362_vm0 = vcmask (!%p239_p2), 261120   ;;  %v1107_v12 = vld [vmem:[%s1266_s3 + $0x10] sm:$0xff] (!%p239_p2)   ;;  %vm547_vm1 = vcmask (!%p239_p2), 523264  }
   0x6   : > { %242 = sbr.rel (%p239_p2) target bundleno = 704 (0x2c0), region = 48  ;;  %p271_p3 = scmp.lt.s32.totalorder (!%p239_p2), %s930_s28, 31  ;;  %1015 = vmatprep.subr.bf16.mxu0 (!%p239_p2), %v1095_v0  ;;  %1083 = vmatprep.subr.bf16.mxu1 (!%p239_p2), %v1095_v0  ;;  %v1105_v2 = vld [vmem:[%s1266_s3] sm:$0xff] (!%p239_p2)   ;;  %v1106_v6 = vld [vmem:[%s1266_s3 + $0x8] sm:$0xff] (!%p239_p2)   ;;  %v1108_v13 = vld [vmem:[%s1266_s3 + $0x18] sm:$0xff] (!%p239_p2)  }
   0x7   : > { %1016 = vmatpush3.bf16.msra.mxu0 (!%p239_p2), %v1095_v0  ;;  %1085 = vmatpush3.bf16.msra.mxu1 (!%p239_p2), %v1095_v0  ;;  %v1109_v14 = vld [vmem:[%s1268_s5] sm:$0xff] (!%p239_p2)   ;;  %v1110_v15 = vld [vmem:[%s1268_s5 + $0x8] sm:$0xff] (!%p239_p2)  }
   0x8   : > { %1017 = vmatprep.subr.bf16.mxu0 (!%p239_p2), %v1096_v1  ;;  %1084 = vmatprep.subr.bf16.mxu1 (!%p239_p2), %v1096_v1  ;;  %v934_v16 = vld [vmem:[%s1265_s2] ss:$0 sm:$0xff] (!%p239_p2) }
   0xb   : > { %1018 = vmatpush3.bf16.msra.mxu0 (!%p239_p2), %v1096_v1  ;;  %1086 = vmatpush3.bf16.msra.mxu1 (!%p239_p2), %v1096_v1 }
   0xc   : > { %1035 = vmatprep.subr.bf16.mxu1 (!%p239_p2), %v1105_v2  ;;  %1059 = vmatprep.subr.bf16.mxu0 (!%p239_p2), %v1109_v14 }
   0xd   : > { %s1272_s28 = smov (!%p271_p3, %s930_s28), 31 }
   0xe   : > { %s931_s10 = sshll.u32 %s1272_s28, 2  ;;  %s933_s11 = sshll.u32 %s1272_s28, 3 }
   0xf   : > { %s274_s13 = scalar_lea.vmem %s1263_s0, %s931_s10  ;;  %s1242_s16 = scalar_lea.vmem %s1270_s7, %s933_s11 }
  0x10   : > { %v1097_v3 = vld [vmem:[%s274_s13] sm:$0xff]   ;;  %v1098_v4 = vld [vmem:[%s274_s13 + $0x8] sm:$0xff]   ;;  %v1099_v5 = vld [vmem:[%s274_s13 + $0x10] sm:$0xff]  }
  0x11   : > { %1019 = vmatprep.mubr.msk.bf16.mxu0 %vm362_vm0, %v1097_v3  ;;  %v1101_v7 = vld [vmem:[%s274_s13 + $0x20] sm:$0xff]   ;;  %v1102_v8 = vld [vmem:[%s274_s13 + $0x28] sm:$0xff]   ;;  %v1103_v9 = vld [vmem:[%s274_s13 + $0x30] sm:$0xff]  }
  0x12   : > { %1020 = vmatmul.mubr.msk.bf16.vlgmr.msra.gmra.mrb[0].mxu0 %vm362_vm0, %v1098_v4  ;;  %1027 = vmatprep.mubr.msk.bf16.mxu1 %vm362_vm0, %v1101_v7  ;;  %v1100_v10 = vld [vmem:[%s274_s13 + $0x18] sm:$0xff]  }
  0x13   : > { %1023 = vmatprep.mubr.msk.bf16.mxu0 %vm362_vm0, %v1099_v5  ;;  %1028 = vmatmul.mubr.msk.bf16.vlgmr.msra.gmra.mrb[0].mxu1 %vm362_vm0, %v1102_v8  ;;  %v1104_v11 = vld [vmem:[%s274_s13 + $0x38] sm:$0xff]  }
  0x14   : > { %1031 = vmatprep.mubr.msk.bf16.mxu1 %vm362_vm0, %v1103_v9  ;;  %1036 = vmatpush3.bf16.msra.mxu1 %v1105_v2  ;;  %v1111_v9 = vld [vmem:[%s1268_s5 + $0x10] sm:$0xff]  }
  0x15   : > { %1037 = vmatprep.subr.bf16.mxu1 %v1106_v6  ;;  %1060 = vmatpush3.bf16.msra.mxu0 %v1109_v14 }
  0x16   : > { %1061 = vmatprep.subr.bf16.mxu0 %v1110_v15 }
  0x18   : > { %1038 = vmatpush3.bf16.msra.mxu1 %v1106_v6 }
  0x19   : > { %1039 = vmatprep.subr.bf16.mxu1 %v1107_v12  ;;  %1062 = vmatpush3.bf16.msra.mxu0 %v1110_v15 }
  0x1a   : > { %1024 = vmatmul.mubr.msk.bf16.gmra.mrb[4].mxu0 %vm362_vm0, %v1100_v10  ;;  %1063 = vmatprep.subr.bf16.mxu0 %v1111_v9  ;;  %v1112_v10 = vld [vmem:[%s1268_s5 + $0x18] sm:$0xff]  }
  0x1b   : > { %1032 = vmatmul.mubr.msk.bf16.gmra.mrb[4].mxu1 %vm362_vm0, %v1104_v11  ;;  %v953_v11 = vld [vmem:[%s1267_s4] ss:$0 sm:$0xff] }
  0x1c   : > { %1040 = vmatpush3.bf16.msra.mxu1 %v1107_v12 }
  0x1d   : > { %1041 = vmatprep.subr.bf16.mxu1 %v1108_v13  ;;  %1064 = vmatpush3.bf16.msra.mxu0 %v1111_v9 }
  0x1e   : > { %1065 = vmatprep.subr.bf16.mxu0 %v1112_v10 }
  0x20   : > { %1042 = vmatpush3.bf16.msra.mxu1 %v1108_v13 }
  0x21   : > { %1066 = vmatpush3.bf16.msra.mxu0 %v1112_v10 }
  0xe5   : > { %v1021_v17 = vpop.f32.mrb[0].mxu0 }
  0xe6   : > { %v430_v18 = vadd.f32 %v1021_v17, %v934_v16  ;;  %v421_v19 = vpop.f32.mrb[1].mxu0  ;;  %v1029_v25 = vpop.f32.mrb[0].mxu1 }
  0xe7   : > { %v422_v20 = vadd.f32 %v934_v16, %v421_v19  ;;  %v1022_v21 = vpop.f32.mrb[2].mxu0  ;;  %v462_v28 = vadd.f32 %v1029_v25, %v934_v16  ;;  %v453_v29 = vpop.f32.mrb[1].mxu1 }
  0xe8   : > { %v433_v22 = vadd.f32 %v1022_v21, %v934_v16  ;;  %v424_v23 = vpop.f32.mrb[3].mxu0  ;;  %v486_v26 = vmax.f32 %v430_v18, 0.0  ;;  %v454_v32 = vadd.f32 %v934_v16, %v453_v29  ;;  %v1030_v33 = vpop.f32.mrb[2].mxu1 }
  0xe9   : > { %v425_v24 = vadd.f32 %v934_v16, %v424_v23  ;;  %v484_v30 = vmax.f32 %v422_v20, 0.0  ;;  %v494_v35 = vmax.f32 %v462_v28, 0.0  ;;  %v465_v36 = vadd.f32 %v1030_v33, %v934_v16  ;;  %v456_v37 = vpop.f32.mrb[3].mxu1 }
  0xea   : > { %v487_v27 = vmax.f32 %v433_v22, 0.0  ;;  %v492_v40 = vmax.f32 %v454_v32, 0.0  ;;  %v457_v41 = vadd.f32 %v934_v16, %v456_v37 }
  0xeb   : > { %v485_v31 = vmax.f32 %v425_v24, 0.0  ;;  %v495_v44 = vmax.f32 %v465_v36, 0.0 }
  0xec   : > { %v501_v34 = vpack.c.bf16 %v487_v27, %v486_v26  ;;  %v493_v47 = vmax.f32 %v457_v41, 0.0 }
  0xed   : > { %v500_v38 = vpack.c.bf16 %v485_v31, %v484_v30  ;;  %v1025_v39 = vpop.f32.mrb[4].mxu0  ;;  %v505_v50 = vpack.c.bf16 %v495_v44, %v494_v35 }
  0xee   : > { %v446_v42 = vadd.f32 %v1025_v39, %v934_v16  ;;  %v437_v43 = vpop.f32.mrb[5].mxu0  ;;  %v504_v52 = vpack.c.bf16 %v493_v47, %v492_v40  ;;  %v1033_v53 = vpop.f32.mrb[4].mxu1 }
  0xef   : > { %v438_v45 = vadd.f32 %v934_v16, %v437_v43  ;;  %v1026_v46 = vpop.f32.mrb[6].mxu0  ;;  %1043 = vmatprep.mubr.msk.bf16.mxu1 %vm547_vm1, %v500_v38  ;;  %v478_v56 = vadd.f32 %v1033_v53, %v934_v16  ;;  %v469_v57 = vpop.f32.mrb[5].mxu1 }
  0xf0   : > { %v449_v48 = vadd.f32 %v1026_v46, %v934_v16  ;;  %v440_v49 = vpop.f32.mrb[7].mxu0  ;;  %1044 = vmatmul.mubr.msk.bf16.vlgmr.msra.gmra.mrb[8].mxu1 %vm547_vm1, %v501_v34  ;;  %v490_v54 = vmax.f32 %v446_v42, 0.0  ;;  %v470_v60 = vadd.f32 %v934_v16, %v469_v57  ;;  %v1034_v61 = vpop.f32.mrb[6].mxu1 }
  0xf1   : > { %v441_v51 = vadd.f32 %v934_v16, %v440_v49  ;;  %v488_v58 = vmax.f32 %v438_v45, 0.0  ;;  %v498_v63 = vmax.f32 %v478_v56, 0.0  ;;  %v481_v0 = vadd.f32 %v1034_v61, %v934_v16  ;;  %v472_v1 = vpop.f32.mrb[7].mxu1 }
  0xf2   : > { %v491_v55 = vmax.f32 %v449_v48, 0.0  ;;  %v496_v3 = vmax.f32 %v470_v60, 0.0  ;;  %v473_v4 = vadd.f32 %v934_v16, %v472_v1 }
  0xf3   : > { %v489_v59 = vmax.f32 %v441_v51, 0.0  ;;  %v499_v5 = vmax.f32 %v481_v0, 0.0 }
  0xf4   : > { %v503_v62 = vpack.c.bf16 %v491_v55, %v490_v54  ;;  %v497_v6 = vmax.f32 %v473_v4, 0.0  ;;  %v966_v4 = vld [vmem:[%s1269_s6] ss:$0 sm:$0xff] }
  0xf5   : > { %v502_v2 = vpack.c.bf16 %v489_v59, %v488_v58  ;;  %v507_v7 = vpack.c.bf16 %v499_v5, %v498_v63 }
  0xf6   : > { %v506_v8 = vpack.c.bf16 %v497_v6, %v496_v3 }
  0xf7   : > { %1047 = vmatprep.mubr.msk.bf16.mxu1 %vm547_vm1, %v502_v2 }
  0xf8   : > { %1048 = vmatmul.mubr.msk.bf16.gmra.mrb[12].mxu1 %vm547_vm1, %v503_v62 }
  0xf9   : > { %1051 = vmatprep.mubr.msk.bf16.mxu1 %vm547_vm1, %v504_v52 }
 0x100   : > { %1052 = vmatmul.mubr.msk.bf16.gmra.mrb[16].mxu1 %vm547_vm1, %v505_v50 }
 0x101   : > { %1055 = vmatprep.mubr.msk.bf16.mxu1 %vm547_vm1, %v506_v8 }
 0x108   : > { %1056 = vmatmul.mubr.msk.bf16.gmra.mrb[20].mxu1 %vm547_vm1, %v507_v7 }
 0x1c3   : > { %v1045_v12 = vpop.f32.mrb[8].mxu1 }
 0x1c4   : > { %v615_v13 = vadd.f32 %v1045_v12, %v953_v11  ;;  %v606_v14 = vpop.f32.mrb[9].mxu1 }
 0x1c5   : > { %v607_v15 = vadd.f32 %v953_v11, %v606_v14  ;;  %v1046_v16 = vpop.f32.mrb[10].mxu1 }
 0x1c6   : > { %v618_v17 = vadd.f32 %v1046_v16, %v953_v11  ;;  %v609_v18 = vpop.f32.mrb[11].mxu1  ;;  %v671_v20 = vmax.f32 %v615_v13, 0.0 }
 0x1c7   : > { %v610_v19 = vadd.f32 %v953_v11, %v609_v18  ;;  %v669_v22 = vmax.f32 %v607_v15, 0.0 }
 0x1c8   : > { %v672_v21 = vmax.f32 %v618_v17, 0.0 }
 0x1c9   : > { %v670_v23 = vmax.f32 %v610_v19, 0.0 }
 0x1ca   : > { %v686_v24 = vpack.c.bf16 %v672_v21, %v671_v20 }
 0x1cb   : > { %v685_v25 = vpack.c.bf16 %v670_v23, %v669_v22  ;;  %v1049_v26 = vpop.f32.mrb[12].mxu1 }
 0x1cc   : > { %v631_v27 = vadd.f32 %v1049_v26, %v953_v11  ;;  %v622_v28 = vpop.f32.mrb[13].mxu1 }
 0x1cd   : > { %v623_v29 = vadd.f32 %v953_v11, %v622_v28  ;;  %v1050_v30 = vpop.f32.mrb[14].mxu1  ;;  %1067 = vmatprep.mubr.msk.bf16.mxu0 %vm547_vm1, %v685_v25 }
 0x1ce   : > { %v634_v31 = vadd.f32 %v1050_v30, %v953_v11  ;;  %v625_v32 = vpop.f32.mrb[15].mxu1  ;;  %1068 = vmatmul.mubr.msk.bf16.vlgmr.msra.gmra.mrb[8].mxu0 %vm547_vm1, %v686_v24  ;;  %v675_v34 = vmax.f32 %v631_v27, 0.0 }
 0x1cf   : > { %v626_v33 = vadd.f32 %v953_v11, %v625_v32  ;;  %v673_v36 = vmax.f32 %v623_v29, 0.0 }
 0x1d0   : > { %v676_v35 = vmax.f32 %v634_v31, 0.0 }
 0x1d1   : > { %v674_v37 = vmax.f32 %v626_v33, 0.0 }
 0x1d2   : > { %v688_v38 = vpack.c.bf16 %v676_v35, %v675_v34 }
 0x1d3   : > { %v687_v39 = vpack.c.bf16 %v674_v37, %v673_v36  ;;  %v1053_v40 = vpop.f32.mrb[16].mxu1 }
 0x1d4   : > { %v647_v41 = vadd.f32 %v1053_v40, %v953_v11  ;;  %v638_v42 = vpop.f32.mrb[17].mxu1 }
 0x1d5   : > { %v639_v43 = vadd.f32 %v953_v11, %v638_v42  ;;  %v1054_v44 = vpop.f32.mrb[18].mxu1  ;;  %1071 = vmatprep.mubr.msk.bf16.mxu0 %vm547_vm1, %v687_v39 }
 0x1d6   : > { %v650_v45 = vadd.f32 %v1054_v44, %v953_v11  ;;  %v641_v46 = vpop.f32.mrb[19].mxu1  ;;  %1072 = vmatmul.mubr.msk.bf16.gmra.mrb[12].mxu0 %vm547_vm1, %v688_v38  ;;  %v679_v48 = vmax.f32 %v647_v41, 0.0 }
 0x1d7   : > { %v642_v47 = vadd.f32 %v953_v11, %v641_v46  ;;  %v677_v50 = vmax.f32 %v639_v43, 0.0 }
 0x1d8   : > { %v680_v49 = vmax.f32 %v650_v45, 0.0 }
 0x1d9   : > { %v678_v51 = vmax.f32 %v642_v47, 0.0 }
 0x1da   : > { %v690_v52 = vpack.c.bf16 %v680_v49, %v679_v48 }
 0x1db   : > { %v689_v53 = vpack.c.bf16 %v678_v51, %v677_v50  ;;  %v1057_v54 = vpop.f32.mrb[20].mxu1 }
 0x1dc   : > { %v663_v55 = vadd.f32 %v1057_v54, %v953_v11  ;;  %v654_v56 = vpop.f32.mrb[21].mxu1 }
 0x1dd   : > { %v655_v57 = vadd.f32 %v953_v11, %v654_v56  ;;  %v1058_v58 = vpop.f32.mrb[22].mxu1  ;;  %1075 = vmatprep.mubr.msk.bf16.mxu0 %vm547_vm1, %v689_v53 }
 0x1de   : > { %v666_v59 = vadd.f32 %v1058_v58, %v953_v11  ;;  %v657_v60 = vpop.f32.mrb[23].mxu1  ;;  %1076 = vmatmul.mubr.msk.bf16.gmra.mrb[16].mxu0 %vm547_vm1, %v690_v52  ;;  %v683_v62 = vmax.f32 %v663_v55, 0.0 }
 0x1df   : > { %v658_v61 = vadd.f32 %v953_v11, %v657_v60  ;;  %v681_v0 = vmax.f32 %v655_v57, 0.0 }
 0x1e0   : > { %v684_v63 = vmax.f32 %v666_v59, 0.0 }
 0x1e1   : > { %v682_v1 = vmax.f32 %v658_v61, 0.0 }
 0x1e2   : > { %v692_v2 = vpack.c.bf16 %v684_v63, %v683_v62 }
 0x1e3   : > { %v691_v3 = vpack.c.bf16 %v682_v1, %v681_v0 }
 0x1e5   : > { %1079 = vmatprep.mubr.msk.bf16.mxu0 %vm547_vm1, %v691_v3 }
 0x1e6   : > { %1080 = vmatmul.mubr.msk.bf16.gmra.mrb[20].mxu0 %vm547_vm1, %v692_v2 }
 0x2a1   : > { %v1069_v5 = vpop.f32.mrb[8].mxu0 }
 0x2a2   : > { %v799_v6 = vadd.f32 %v1069_v5, %v966_v4  ;;  %v790_v7 = vpop.f32.mrb[9].mxu0 }
 0x2a3   : > { %v791_v8 = vadd.f32 %v966_v4, %v790_v7  ;;  %v1070_v9 = vpop.f32.mrb[10].mxu0 }
 0x2a4   : > { %855 = vst [vmem:[%s1242_s16 + $0x10] sm:$0xff] %v799_v6  ;;  %v802_v10 = vadd.f32 %v1070_v9, %v966_v4  ;;  %v793_v11 = vpop.f32.mrb[11].mxu0 }
 0x2a5   : > { %853 = vst [vmem:[%s1242_s16] sm:$0xff] %v791_v8  ;;  %v794_v12 = vadd.f32 %v966_v4, %v793_v11 }
 0x2a6   : > { %856 = vst [vmem:[%s1242_s16 + $0x18] sm:$0xff] %v802_v10 }
 0x2a7   : > { %854 = vst [vmem:[%s1242_s16 + $0x8] sm:$0xff] %v794_v12 }
 0x2a9   : > { %v1073_v13 = vpop.f32.mrb[12].mxu0 }
 0x2aa   : > { %v815_v14 = vadd.f32 %v1073_v13, %v966_v4  ;;  %v806_v15 = vpop.f32.mrb[13].mxu0 }
 0x2ab   : > { %v807_v16 = vadd.f32 %v966_v4, %v806_v15  ;;  %v1074_v17 = vpop.f32.mrb[14].mxu0 }
 0x2ac   : > { %859 = vst [vmem:[%s1242_s16 + $0x30] sm:$0xff] %v815_v14  ;;  %v818_v18 = vadd.f32 %v1074_v17, %v966_v4  ;;  %v809_v19 = vpop.f32.mrb[15].mxu0 }
 0x2ad   : > { %857 = vst [vmem:[%s1242_s16 + $0x20] sm:$0xff] %v807_v16  ;;  %v810_v20 = vadd.f32 %v966_v4, %v809_v19 }
 0x2ae   : > { %860 = vst [vmem:[%s1242_s16 + $0x38] sm:$0xff] %v818_v18 }
 0x2af   : > { %858 = vst [vmem:[%s1242_s16 + $0x28] sm:$0xff] %v810_v20 }
 0x2b1   : > { %v1077_v21 = vpop.f32.mrb[16].mxu0 }
 0x2b2   : > { %v831_v22 = vadd.f32 %v1077_v21, %v966_v4  ;;  %v822_v23 = vpop.f32.mrb[17].mxu0 }
 0x2b3   : > { %v823_v24 = vadd.f32 %v966_v4, %v822_v23  ;;  %v1078_v25 = vpop.f32.mrb[18].mxu0 }
 0x2b4   : > { %863 = vst [vmem:[%s1242_s16 + $0x50] sm:$0xff] %v831_v22  ;;  %v834_v26 = vadd.f32 %v1078_v25, %v966_v4  ;;  %v825_v27 = vpop.f32.mrb[19].mxu0 }
 0x2b5   : > { %861 = vst [vmem:[%s1242_s16 + $0x40] sm:$0xff] %v823_v24  ;;  %v826_v28 = vadd.f32 %v966_v4, %v825_v27 }
 0x2b6   : > { %864 = vst [vmem:[%s1242_s16 + $0x58] sm:$0xff] %v834_v26 }
 0x2b7   : > { %862 = vst [vmem:[%s1242_s16 + $0x48] sm:$0xff] %v826_v28 }
 0x2b9   : > { %v1081_v29 = vpop.f32.mrb[20].mxu0 }
 0x2ba   : > { %v847_v30 = vadd.f32 %v1081_v29, %v966_v4  ;;  %v838_v31 = vpop.f32.mrb[21].mxu0 }
 0x2bb   : > { %v839_v32 = vadd.f32 %v966_v4, %v838_v31  ;;  %v1082_v33 = vpop.f32.mrb[22].mxu0 }
 0x2bc   : > { %867 = vst [vmem:[%s1242_s16 + $0x70] sm:$0xff] %v847_v30  ;;  %v850_v34 = vadd.f32 %v1082_v33, %v966_v4  ;;  %v841_v35 = vpop.f32.mrb[23].mxu0 }
 0x2bd   : > { %865 = vst [vmem:[%s1242_s16 + $0x60] sm:$0xff] %v839_v32  ;;  %v842_v36 = vadd.f32 %v966_v4, %v841_v35 }
 0x2be   : > { %868 = vst [vmem:[%s1242_s16 + $0x78] sm:$0xff] %v850_v34 }
 0x2bf   : > { %866 = vst [vmem:[%s1242_s16 + $0x68] sm:$0xff] %v842_v36 }
 0x2c0 PF: > { %s17_s24 = sadd.s32 1, %s1119_s24  }
 0x2c1   : > { %p14_p4 = scmp.ge.s32.totalorder %s17_s24, 4  }
 0x2c3   :  { %16 = sbr.rel (!%p14_p4) target bundleno = 1 (0x1), region = 78 }

</bundles_post_ra>
